<compile_context>
chip_gen: v6e
topology: v6e:2x2x1
jax: 0.10.0
libtpu: 0.0.40
codegen_flags: <defaults>
</compile_context>

<pallas_src>
import math
import functools

import jax
import jax.numpy as jnp
from jax.experimental import pallas as pl
from jax.experimental.pallas import tpu as pltpu

_MiB = 1024 * 1024


def _round_up(x, m):
    return ((x + m - 1) // m) * m


@functools.lru_cache(maxsize=1)
def _vmem_capacity_bytes():
    """Physical VMEM per core; conservative (v7x-sized) fallback if unknown."""
    try:
        return int(pltpu.get_tpu_info().vmem_capacity_bytes)
    except Exception:
        return 64 * _MiB


_HAS_BUFFERED = hasattr(pl, "Buffered")


def _spec(shape, index_map, single_buffer=False):
    """BlockSpec helper; requests a single VMEM buffer for invariant operands."""
    if single_buffer and _HAS_BUFFERED:
        try:
            return pl.BlockSpec(shape, index_map, pipeline_mode=pl.Buffered(1))
        except TypeError:
            pass
    return pl.BlockSpec(shape, index_map)


def _ssm_kernel(u_ref, w_ref, o_ref):
    """One (row-tile, column-tile) of  y = u @ W  with f32 accumulation.

    u_ref : (tm, padded_d)   VMEM tile of flattened input rows (full contraction dim)
    w_ref : (padded_d, tn)   resident slab of W = C^T + diag(D)
    o_ref : (tm, tn)         output tile
    """
    o_ref[...] = jnp.dot(
        u_ref[...], w_ref[...], preferred_element_type=jnp.float32
    ).astype(o_ref.dtype)


@functools.partial(jax.jit, static_argnames=("tm", "tn", "cast_to_bf16"))
def selective_ssm_forward(u, C, D_vec, *, tm=None, tn=None, cast_to_bf16=False):
    """Forward pass matching SelectiveSSM.forward(u) on the non-CUDA path.

    u:     (batch, seq_len, d_model)
    C:     (d_state, d_model)
    D_vec: (d_model,)
    returns (batch, seq_len, d_state)  (== d_model)
    """
    b, l, d_model = u.shape
    d_state, c_cols = C.shape
    assert c_cols == d_model
    assert d_state == d_model, "reference broadcast requires d_state == d_model"

    out_dtype = u.dtype
    if cast_to_bf16:
        u = u.astype(jnp.bfloat16)

    # Fold the skip connection into the weight (exact since d_state == d_model):
    #   y = u @ C^T + u * D  ==  u @ (C^T + diag(D))
    W = C.T
    idx = jnp.arange(d_state)
    W = W.at[idx, idx].add(D_vec.astype(W.dtype))
    if W.dtype != u.dtype:
        W = W.astype(u.dtype)  # never run a mixed-dtype dot on the MXU

    u_item = jnp.dtype(u.dtype).itemsize
    w_item = jnp.dtype(W.dtype).itemsize
    o_item = jnp.dtype(out_dtype).itemsize
    bl = b * l

    # --- per-generation VMEM budget ----------------------------------------
    vmem = _vmem_capacity_bytes()
    budget = (vmem * 11) // 20     # ~55% of physical for our tiles
    vmem_limit = (vmem * 3) // 4   # ~75% scoped limit, leaves compiler headroom

    # --- d_state (output-column) tiling: keep only a slab of W resident when
    # the full W would eat more than 1/4 of the budget.
    full_w_bytes = d_model * d_state * w_item
    if tn is not None:
        split = tn != d_state
        if split:
            assert tn % 128 == 0, "split column tile must be a multiple of 128"
    else:
        split = full_w_bytes > budget // 4
        if split:
            tn = 512
            while tn > 128 and _round_up(d_model, 128) * tn * w_item > budget // 4:
                tn //= 2
        else:
            tn = d_state

    if split:
        padded_d = _round_up(d_model, tn)
        n_state = padded_d // tn
    else:
        padded_d = d_model
        n_state = 1
    out_cols = n_state * tn

    w_single = (not split) and _HAS_BUFFERED
    w_bufs = 1 if w_single else 2

    # --- row tile: >=2 row grid steps (v7x megacore), then as big as fits ----
    if tm is None:
        tm = min(1024, _round_up(max(1, -(-bl // 2)), 8))
        resident = w_bufs * padded_d * tn * w_item

        def _tile_bytes(t):
            return (2 * u_item * t * padded_d   # double-buffered u tile
                    + 2 * o_item * t * tn       # double-buffered out tile
                    + 4 * t * tn)               # f32 MXU result temporary

        while tm > 8 and resident + _tile_bytes(tm) > budget:
            tm //= 2
        tm = max(8, (tm // 8) * 8)

    # --- ceil-div grid with zero padding; padded rows/cols sliced off below --
    padded_bl = _round_up(bl, tm)
    u2 = u.reshape(bl, d_model)
    if padded_bl != bl or padded_d != d_model:
        u2 = jnp.pad(u2, ((0, padded_bl - bl), (0, padded_d - d_model)))
    if padded_d != d_model:
        W = jnp.pad(W, ((0, padded_d - d_model), (0, padded_d - d_state)))

    cost = pl.CostEstimate(
        flops=2 * padded_bl * padded_d * out_cols,
        transcendentals=0,
        bytes_accessed=int(u_item * padded_bl * padded_d
                           + w_item * padded_d * out_cols
                           + o_item * padded_bl * out_cols),
    )

    out = pl.pallas_call(
        _ssm_kernel,
        out_shape=jax.ShapeDtypeStruct((padded_bl, out_cols), out_dtype),
        grid_spec=pltpu.PrefetchScalarGridSpec(
            num_scalar_prefetch=0,
            grid=(padded_bl // tm, n_state),
            in_specs=[
                # u row tile: invariant along the column axis -> not re-DMA'd.
                pl.BlockSpec((tm, padded_d), lambda i, j: (i, 0)),
                # W slab: single-buffered when fully resident (n_state == 1).
                _spec((padded_d, tn), lambda i, j: (0, j), single_buffer=w_single),
            ],
            out_specs=pl.BlockSpec((tm, tn), lambda i, j: (i, j)),
        ),
        compiler_params=pltpu.CompilerParams(
            dimension_semantics=("parallel", "parallel"),  # shards across v7x's 2 TCs
            vmem_limit_bytes=int(vmem_limit),
        ),
        cost_estimate=cost,
    )(u2, W)

    out = out[:bl, :d_state]
    return out.reshape(b, l, d_state)


def init_selective_ssm_params(key, d_model, d_state,
                              dt_min=0.001, dt_max=0.1, dt_scale=1.0,
                              dt_init_floor=1e-4):
    """Deterministic synthetic parameters matching SelectiveSSM.__init__ shapes."""
    k_a, k_b, k_c, k_dt, k_d = jax.random.split(key, 5)
    params = {}
    params["A_log"] = jax.random.normal(k_a, (d_state,), jnp.float32)
    params["A_log_scale"] = jnp.ones((1,), jnp.float32) * math.log(dt_scale)
    params["B"] = jax.random.normal(k_b, (d_model, d_state), jnp.float32) / math.sqrt(d_state)
    params["C"] = jax.random.normal(k_c, (d_state, d_model), jnp.float32) / math.sqrt(d_state)
    dt = jnp.exp(jax.random.uniform(k_dt, (d_model,), jnp.float32)
                 * (math.log(dt_max) - math.log(dt_min)) + math.log(dt_min))
    dt = jnp.maximum(dt, dt_init_floor)
    params["dt_log"] = jnp.log(dt)
    params["D"] = jax.random.normal(k_d, (d_model,), jnp.float32)
    return params


def _reference(u, C, D_vec):
    # Pure-JAX reference of the PyTorch non-CUDA branch:
    # y[b,l,n] = sum_d u[b,l,d] * C[n,d] + u[b,l,n] * D[n]
    return (jnp.einsum("bld,nd->bln", u, C, precision=jax.lax.Precision.HIGHEST)
            + u * D_vec)


def _check(y, y_ref, atol, rtol, msg):
    assert y.shape == y_ref.shape, msg
    assert jnp.allclose(y, y_ref, atol=atol, rtol=rtol), msg


if __name__ == "__main__":
    key = jax.random.PRNGKey(0)
    k_params, k_u, k_u2, k_p3, k_u3 = jax.random.split(key, 5)

    # 1) Small shapes consistent with the module (reference requires d_state == d_model).
    batch, seq_len, d_model, d_state = 2, 8, 32, 32
    params = init_selective_ssm_params(k_params, d_model, d_state)
    u = jax.random.normal(k_u, (batch, seq_len, d_model), jnp.float32)

    y = jax.block_until_ready(selective_ssm_forward(u, params["C"], params["D"]))
    _check(y, _reference(u, params["C"], params["D"]), 1e-4, 1e-4, "mismatch (base)")

    # 2) Ceil-div / padding path: batch*seq not a multiple of the row tile.
    b2, l2 = 3, 5
    u_odd = jax.random.normal(k_u2, (b2, l2, d_model), jnp.float32)
    y_odd = jax.block_until_ready(
        selective_ssm_forward(u_odd, params["C"], params["D"], tm=8))
    _check(y_odd, _reference(u_odd, params["C"], params["D"]), 1e-4, 1e-4,
           "mismatch (padded rows)")

    # 3) d_state-split path (2 column blocks), as used for large d_model on v7x.
    d3 = 256
    params3 = init_selective_ssm_params(k_p3, d3, d3)
    u3 = jax.random.normal(k_u3, (2, 4, d3), jnp.float32)
    y3 = jax.block_until_ready(
        selective_ssm_forward(u3, params3["C"], params3["D"], tn=128))
    _check(y3, _reference(u3, params3["C"], params3["D"]), 5e-4, 5e-4,
           "mismatch (d_state split)")

    # 4) Reduced-precision path (bf16 inputs, f32 accumulation, f32 output).
    y_bf = jax.block_until_ready(
        selective_ssm_forward(u, params["C"], params["D"], cast_to_bf16=True))
    _check(y_bf, _reference(u, params["C"], params["D"]), 0.1, 0.1,
           "mismatch (bf16 path)")

    print("KERNEL_OK")
</pallas_src>

<mosaic_0001>
module attributes {stable_mosaic.version = 11 : i64} {
  func.func private @main(%arg0: i32) attributes {dimension_semantics = [#tpu.dimension_semantics<core_parallel>], iteration_bounds = array<i64: 2>, tpu.core_type = #tpu.core_type<sc_scalar_subcore>, window_params = []} {
    return
  }
}

module attributes {stable_mosaic.version = 11 : i64} {
  func.func private @main(%arg0: i32) attributes {dimension_semantics = [#tpu.dimension_semantics<core_parallel>], iteration_bounds = array<i64: 2>, tpu.core_type = #tpu.core_type<sc_scalar_subcore>, window_params = []} {
    return
  }
}

module attributes {stable_mosaic.version = 11 : i64} {
  func.func @_ssm_kernel(%arg0: i32, %arg1: i32, %arg2: memref<8x32xf32, #tpu.memory_space<vmem>>, %arg3: memref<32x32xf32, #tpu.memory_space<vmem>>, %arg4: memref<8x32xf32, #tpu.memory_space<vmem>>) attributes {dimension_semantics = [#tpu.dimension_semantics<parallel>, #tpu.dimension_semantics<parallel>], iteration_bounds = array<i64: 2, 1>, scalar_prefetch = 0 : i64, scratch_operands = 0 : i64, tpu.core_type = #tpu.core_type<tc>, window_params = [{transform_indices = @transform_0, window_bounds = array<i64: 8, 32>}, {pipeline_mode = #tpu.pipeline_mode<synchronous>, transform_indices = @transform_1, window_bounds = array<i64: 32, 32>}, {transform_indices = @transform_2, window_bounds = array<i64: 8, 32>}]} {
    %c0 = arith.constant 0 : index
    %c0_0 = arith.constant 0 : index
    %0 = vector.load %arg2[%c0, %c0_0] : memref<8x32xf32, #tpu.memory_space<vmem>>, vector<8x32xf32>
    %c0_1 = arith.constant 0 : index
    %c0_2 = arith.constant 0 : index
    %1 = vector.load %arg3[%c0_1, %c0_2] : memref<32x32xf32, #tpu.memory_space<vmem>>, vector<32x32xf32>
    %cst = arith.constant dense<0.000000e+00> : vector<8x32xf32>
    %2 = tpu.matmul %0, %1, %cst {dimension_numbers = #tpu.dot_dimension_numbers<[1], [0], [0], [1], [0, 0, 1, 1], [], []>} : vector<8x32xf32>, vector<32x32xf32>, vector<8x32xf32> -> vector<8x32xf32>
    %c0_3 = arith.constant 0 : index
    %c0_4 = arith.constant 0 : index
    %3 = vector.load %arg4[%c0_3, %c0_4] : memref<8x32xf32, #tpu.memory_space<vmem>>, vector<8x32xf32>
    tpu.vector_store %arg4[%c0_3, %c0_4], %2 {strides = array<i32>} : memref<8x32xf32, #tpu.memory_space<vmem>>, vector<8x32xf32>,
    return
  }
  func.func @transform_0(%arg0: i32, %arg1: i32) -> (i32, i32) {
    %c0_i32 = arith.constant 0 : i32
    %c0_i32_0 = arith.constant 0 : i32
    return %arg0, %c0_i32 : i32, i32
  }
  func.func @transform_1(%arg0: i32, %arg1: i32) -> (i32, i32) {
    %c0_i32 = arith.constant 0 : i32
    %c0_i32_0 = arith.constant 0 : i32
    return %c0_i32, %arg1 : i32, i32
  }
  func.func @transform_2(%arg0: i32, %arg1: i32) -> (i32, i32) {
    %c0_i32 = arith.constant 0 : i32
    return %arg0, %arg1 : i32, i32
  }
}

</mosaic_0001>

<bundles_post_ra>
// kernel: selective_ssm_forward.1
= control target key start
LH: loop header
LB: loop body
LE: loop exit
PB: predicated region body
PF: predicated region fallthrough
CT: control target
= control target key end

     0   :  { %7 = vsyncpa [#allocation3], 0  ;;  %s653_s0 = inlined_call_operand.vmem [shape: f32[16,32], index: 0, kind: input, shape index: {}]   ;;  %s654_s1 = inlined_call_operand.vmem [shape: f32[32,32], index: 1, kind: input, shape index: {}]   ;;  %s655_s2 = inlined_call_operand.hbm [shape: f32[16,32], index: 2, kind: output, shape index: {}]  }
   0x1   :  { %9 = vsyncpa [#allocation3 + $0x1], 0  ;;  %s530_s9 = smov 0   ;;  %s532_s10 = smov 0  }
   0x2   :  { %s534_s11 = smov 0   ;;  %s536_s12 = smov 0  }
   0x3   :  { %s538_s13 = smov 0   ;;  %s540_s14 = smov 0  }
   0x4 LB: > { %s348_s15 = sadd.s32 4294967295, %s510_s14   ;;  %s349_s16 = sadd.s32 4294967294, %s510_s14   ;;  %s510_s14 = sphi %s540_s14, %s15_s14   ;;  %s506_s13 = sphi %s538_s13, %s662_s13   ;;  %s502_s12 = sphi %s536_s12, %s661_s12   ;;  %s498_s11 = sphi %s534_s11, %s660_s11   ;;  %s494_s10 = sphi %s532_s10, %s659_s10   ;;  %s490_s9 = sphi %s530_s9, %s658_s9  }
   0x5   : > { %s27_s17 = sadd.s32 1, %s506_s13  ;;  %s88_s18 = sadd.s32 1, %s498_s11 }
   0x6   : > { %p29_p0 = scmp.ge.s32.totalorder %s27_s17, 2  ;;  %p98_p1 = scmp.ne.s32.totalorder %s498_s11, %s494_s10 }
   0x7   : > { %p99_p2 = scmp.eq.s32.totalorder %s348_s15, 1  ;;  %p104_p3 = scmp.ne.s32.totalorder %s494_s10, %s490_s9 }
   0x8   : > { %s664_s17 = smov (%p29_p0, %s27_s17), 0  ;;  %p105_p5 = scmp.eq.s32.totalorder %s349_s16, 1 }
   0x9   : > { %p570_p4 = por %p99_p2, %p98_p1  ;;  %s83_s20 = ssub.s32 %s506_s13, %s664_s17 }
   0xa   : > { %p353_p6 = scmp.ge.s32.totalorder %s510_s14, 1  ;;  %p86_p7 = scmp.eq.s32.totalorder %s83_s20, 0 }
   0xb   : > { %p577_p8 = por %p105_p5, %p104_p3  ;;  %p137_p9 = scmp.lt.s32.totalorder %s510_s14, 3 }
   0xc   : > { %s583_s22 = scalar_select %p86_p7, %s498_s11, %s88_s18  }
   0xd   : > { %p138_p10 = pnand %p353_p6, %p137_p9 }
   0xe   : > { %p162_p11 = scmp.lt.s32.totalorder (!%p138_p10), %s502_s12, 1  ;;  %s159_s8 = sand.u32 (!%p138_p10), 1, %s494_s10  }
   0xf   : > { %141 = sbr.rel (%p138_p10) target bundleno = 236 (0xec), region = 28  ;;  %s354_s15 = sshll.u32 (!%p138_p10), %s159_s8, 3 }
  0x10   : > { %s358_s16 = sshll.u32 (!%p138_p10), %s502_s12, 7  ;;  %s161_s18 = scalar_lea.vmem (!%p138_p10), [#allocation2], %s354_s15 }
  0x11   : > { %s265_s20 = sshll.u32 (!%p138_p10), %s161_s18, 4  ;;  %s607_s25 = scalar_lea.hbm (!%p138_p10), %s655_s2, %s358_s16  ;;  %s609_s20 = int_to_ptr.vmem [resolvable:$true] %s265_s20 }
  0x12   : > { %s251_s26 = scalar_lea.sflag (!%p138_p10), [#allocation3], %s159_s8 }
  0x14   : > { %v174_v0 = vld [vmem:[%s654_s1 + $0x18] sm:$0xff]  ;;  %v512_v1 = vmov 0.0   ;;  %v173_v2 = vld [vmem:[%s654_s1 + $0x10] sm:$0xff]  ;;  %vm513_vm0 = vmmov 0   ;;  %s163_s27 = scalar_select %p162_p11, %s502_s12, 1  ;;  %v172_v3 = vld [vmem:[%s654_s1 + $0x8] sm:$0xff] }
  0x15   : > { %366 = vmatprep.subr.mxu0 %v512_v1  ;;  %374 = vmatprep.mubr.msk.f32.mxu0 %vm513_vm0, %v512_v1  ;;  %v171_v4 = vld [vmem:[%s654_s1] sm:$0xff]  ;;  %vm175_vm1 = vcmask 261120   ;;  %s514_s12 = smov [#allocation2]  }
  0x16   : > { %367 = vmatpush3.msra.mxu0 %v174_v0  ;;  %s355_s30 = sshll.u32 %s163_s27, 3  ;;  %s434_s27 = scalar_lea.vmem %s609_s20, 128 }
  0x17   : > { %368 = vmatprep.subr.mxu0 %v512_v1  ;;  %s165_s7 = scalar_lea.vmem %s653_s0, %s355_s30  ;;  %p435_p12 = scmp.ne.s32.totalorder %s609_s20, %s434_s27 }
  0x18   : > { %369 = vmatpush3.msra.mxu0 %v173_v2  ;;  %v170_v5 = vld [vmem:[%s165_s7] sm:$0xff]  ;;  %s438_s28 = sshll.u32 %s514_s12, 4  ;;  %s439_s28 = int_to_ptr.vmem [resolvable:$false] %s438_s28 }
  0x19   : > { %370 = vmatprep.subr.mxu0 %v512_v1  ;;  %p436_p13 = pnand %p435_p12, %p570_p4  ;;  %s440_s29 = scalar_lea.vmem %s439_s28, 256 }
  0x1a   : > { %371 = vmatpush3.msra.mxu0 %v172_v3  ;;  %p441_p1 = scmp.lt.s32.totalorder %s609_s20, %s439_s28  ;;  %p442_p2 = scmp.lt.s32.totalorder %s440_s29, %s434_s27 }
  0x1b   : > { %372 = vmatprep.subr.mxu0 %v512_v1  ;;  %p437_p0 = pneg %p436_p13 }
  0x1c   : > { %373 = vmatpush3.msra.mxu0 %v171_v4  ;;  %p443_p3 = por %p442_p2, %p441_p1 }
  0x1d   : > { %375 = vmatmul.mubr.msk.f32.vlgmr.msra.gmra.mxu0 %vm175_vm1, %v170_v5 }
  0x1e   : > { %p444_p5 = pnand %p443_p3, %p437_p0 }
  0xdd   : > { %v245_v6 = vpop.f32.mrf.mxu0 }
  0xde   : > { %249 = vst.msk [vmem:[%s161_s18] sm:$0xff] %vm175_vm1, %v245_v6 }
  0xdf   : > { %v376_v7 = vpop.f32.mrf.mxu0 }
  0xe0   : > { %447 = shalt.err (!%p444_p5)
}
  0xe1   : > { %s448_s30 = scalar_lea.hbm %s607_s25, 128  ;;  %s452_s5 = scalar_lea.hbm %s655_s2, 256 }
  0xe2   : > { %p449_p6 = scmp.ne.s32.totalorder %s607_s25, %s448_s30  ;;  %p453_p10 = scmp.lt.s32.totalorder %s607_s25, %s655_s2 }
  0xe3   : > { %p454_p11 = scmp.lt.s32.totalorder %s452_s5, %s448_s30 }
  0xe4   : > { %p450_p7 = pnand %p449_p6, %p570_p4 }
  0xe5   : > { %p455_p12 = por %p454_p11, %p453_p10 }
  0xe6   : > { %p451_p9 = pneg %p450_p7 }
  0xe8   : > { %p456_p13 = pnand %p455_p12, %p451_p9 }
  0xea   : > { %459 = shalt.err (!%p456_p13)
}
  0xeb   : > { %377 = dma.vmem_to_hbm [thread:$0]  (%p570_p4), %s609_s20, 128, %s607_s25, %s251_s26  }
  0xec PF: > { %p383_p0 = scmp.ge.s32.totalorder %s510_s14, 2  ;;  %s277_s8 = sand.u32 1, %s490_s9  }
  0xed   : > { %s278_s15 = scalar_lea.sflag [#allocation3], %s277_s8 }
  0xee   : > { %p380_p1 = pnand %p383_p0, %p577_p8 }
  0xf0   : > { %p381_p2 = pneg %p380_p1 }
  0xf2   : > { %485 = dma.done.wait (%p381_p2), %s278_s15, 128  }
  0xf3   : > { %487 = vsyncadd (%p381_p2), %s278_s15, 4294967168  ;;  %s15_s14 = sadd.s32 1, %s510_s14   ;;  %s658_s9 = smov %s494_s10 }
  0xf4   : > { %p12_p3 = scmp.ge.s32.totalorder %s15_s14, 4   ;;  %s659_s10 = smov %s498_s11 }
  0xf5   : > { %s660_s11 = smov %s583_s22  ;;  %s661_s12 = smov %s506_s13 }
  0xf6   : > { %s662_s13 = smov %s664_s17  ;;  %14 = sbr.rel (!%p12_p3) target bundleno = 4 (0x4), region = 66 }
  0xfb   :  { %283 = vsyncpa [#allocation3], 1 }
  0xfc   :  { %285 = vsyncpa [#allocation3 + $0x1], 1 }

</bundles_post_ra>
